<compile_context>
chip_gen: v6e
topology: v6e:2x2x1
jax: 0.10.0
libtpu: 0.0.40
codegen_flags: <defaults>
</compile_context>

<pallas_src>
import math

import jax
import jax.numpy as jnp
from jax.experimental import pallas as pl
from jax.experimental.pallas import tpu as pltpu

EPS = 1e-4                       # clamp(min=0.0001, max=1-0.0001)
LOG_EPS = math.log(EPS)
LOG_1M_EPS = math.log(1.0 - EPS)

_LANE = 128
_SUBLANE = 8
# ~512K f32 elements (2 MiB) per input block: amortizes per-step overhead on
# all generations while the double-buffered pipeline (2 inputs x 2 buffers)
# plus elementwise temporaries stays well inside every generation's VMEM once
# vmem_limit_bytes is raised explicitly below.
_TARGET_BLOCK_ELEMS = 512 * 1024


def _cdiv(a, b):
    return -(-a // b)


def _round_up(a, m):
    return _cdiv(a, m) * m


def mask_loss_kernel(yhat_ref, y_ref, sum_ref, cnt_ref):
    """Grid = (B, NC, RT).  The (1,1,8,L) output blocks are the accumulators:
    their index_map ignores the innermost ("arbitrary") r axis, so they stay
    resident in VMEM across the reduction and are written back once per
    (batch, chunk)."""
    r = pl.program_id(2)

    @pl.when(r == 0)
    def _():
        sum_ref[...] = jnp.zeros_like(sum_ref)
        cnt_ref[...] = jnp.zeros_like(cnt_ref)

    x = yhat_ref[0, 0].astype(jnp.float32)   # (TR, L) channel-0 logits
    y = y_ref[0].astype(jnp.float32)         # (TR, L) label map

    is_pos = y == 1.0
    valid = is_pos | (y == 0.0)

    # Sign-select rewrite of the masked BCE terms (single shared softplus):
    #   log(clip(sigmoid(x),  eps, 1-eps)) = clip(log_sigmoid( x), logEPS, log1mEPS)
    #   log(clip(1-sigmoid(x),eps, 1-eps)) = clip(log_sigmoid(-x), logEPS, log1mEPS)
    # with log_sigmoid(z) = min(z, 0) - log(1 + exp(-|z|)) and |z| == |x|, so
    # only ONE clipped log-sigmoid is computed, selected by the label sign.
    # (Clip in log space is monotonicity-equivalent to sigmoid->clip->log.)
    z = jnp.where(is_pos, x, -x)
    ls = jnp.minimum(z, 0.0) - jnp.log(1.0 + jnp.exp(-jnp.abs(x)))
    lp = jnp.clip(ls, LOG_EPS, LOG_1M_EPS)

    contrib = jnp.where(valid, lp, 0.0)
    cnt = jnp.where(valid, 1.0, 0.0)

    # Tree-reduce the (TR, L) contribution to one vreg-shaped (8, L) slab.
    # The reshape only splits the sublane-group axis (L == 128, TR % 8 == 0),
    # so it is a free view; the axis-0 sum is the same VALU add count a big
    # accumulator would need, without the big-accumulator loads/stores.
    tr, l = contrib.shape
    sum_ref[0, 0] += contrib.reshape(tr // _SUBLANE, _SUBLANE, l).sum(axis=0)
    cnt_ref[0, 0] += cnt.reshape(tr // _SUBLANE, _SUBLANE, l).sum(axis=0)


def mask_loss(y_hat, y):
    """y_hat: (B, C, H, W) float logits (f32 or bf16); y: (B, H, W) label map.

    Returns scalar mean mask loss (reduce='mean' path of MaskLoss.forward).
    """
    B, C, H, W = y_hat.shape
    n = H * W
    L = _LANE

    # --- lane-dense tiling (L = 128 always) ----------------------------------
    R_raw = _cdiv(n, L)                         # rows of 128 lanes needed
    NC = 2 if R_raw >= 2 * _SUBLANE else 1      # megacore row-chunk axis (v7x)
    rows_per_chunk = _cdiv(R_raw, NC)
    TR = min(max(_SUBLANE, _TARGET_BLOCK_ELEMS // L),
             _round_up(rows_per_chunk, _SUBLANE))
    RT = _cdiv(rows_per_chunk, TR)              # reduction steps per chunk
    R_pad = NC * RT * TR
    n_pad = R_pad * L

    if n_pad == n:
        # Fast path: no padding needed.  Pass the full NCHW tensor; channel 0
        # is selected by the BlockSpec index_map, so the other C-1 channels
        # never leave HBM and no intermediate copy is made.
        yhat_r = y_hat.reshape(B, C, R_pad, L)
        y_r = y.reshape(B, R_pad, L)
    else:
        # Padded path: slice the channel-0 plane only (one pass over B*H*W
        # elements) and pad the flattened spatial dim.  y_hat is padded with
        # 0.0 (finite => no NaN can leak into the masked contribution) and y
        # with an "excluded" label so padded pixels add nothing to sum/count.
        pad = n_pad - n
        excl = 0.5 if jnp.issubdtype(y.dtype, jnp.floating) else 2
        yhat0 = jnp.pad(y_hat[:, 0, :, :].reshape(B, n), ((0, 0), (0, pad)))
        y_flat = jnp.pad(y.reshape(B, n), ((0, 0), (0, pad)),
                         constant_values=excl)
        yhat_r = yhat0.reshape(B, 1, R_pad, L)
        y_r = y_flat.reshape(B, R_pad, L)

    # --- explicit VMEM budget + advisory cost hint ---------------------------
    block_bytes = TR * L * 4                       # f32 upper bound per block
    vmem_limit = 4 * block_bytes                   # 2 inputs x double-buffer
    vmem_limit += 8 * block_bytes                  # elementwise temp headroom
    vmem_limit += 1 << 20
    vmem_limit = int(min(max(vmem_limit, 16 << 20), 48 << 20))

    total = B * R_pad * L
    cost = pl.CostEstimate(
        flops=int(16 * total),
        transcendentals=int(2 * total),
        bytes_accessed=int(total * (yhat_r.dtype.itemsize + y_r.dtype.itemsize)
                           + 2 * B * NC * _SUBLANE * L * 4),
    )

    sum_p, cnt_p = pl.pallas_call(
        mask_loss_kernel,
        out_shape=(
            jax.ShapeDtypeStruct((B, NC, _SUBLANE, L), jnp.float32),
            jax.ShapeDtypeStruct((B, NC, _SUBLANE, L), jnp.float32),
        ),
        grid_spec=pltpu.PrefetchScalarGridSpec(
            num_scalar_prefetch=0,
            grid=(B, NC, RT),
            in_specs=[
                # Channel 0 selected here (block index 0 on the C axis).
                pl.BlockSpec((1, 1, TR, L),
                             lambda b, c, r: (b, 0, c * RT + r, 0)),
                pl.BlockSpec((1, TR, L),
                             lambda b, c, r: (b, c * RT + r, 0)),
            ],
            out_specs=[
                pl.BlockSpec((1, 1, _SUBLANE, L), lambda b, c, r: (b, c, 0, 0)),
                pl.BlockSpec((1, 1, _SUBLANE, L), lambda b, c, r: (b, c, 0, 0)),
            ],
        ),
        compiler_params=pltpu.CompilerParams(
            dimension_semantics=("parallel", "parallel", "arbitrary"),
            vmem_limit_bytes=vmem_limit),
        cost_estimate=cost,
    )(yhat_r, y_r)

    # Tiny final reduction in the wrapper (keeps both outer grid axes
    # "parallel" so v7x megacore can split (batch, chunk) across TensorCores).
    # NOTE: division yields NaN if no pixel has y==0 or y==1 — same behavior
    # as the PyTorch reference.
    return -jnp.sum(sum_p) / jnp.sum(cnt_p)


def mask_loss_ref(y_hat, y):
    pos = (y == 1.0).astype(jnp.float32)
    neg = (y == 0.0).astype(jnp.float32)
    prob = jnp.clip(jax.nn.sigmoid(y_hat[:, 0, :, :].astype(jnp.float32)),
                    EPS, 1.0 - EPS)
    pl_ = jnp.log(prob) * pos + jnp.log(1.0 - prob) * neg
    return -jnp.sum(pl_) / jnp.sum(pos + neg)


if __name__ == "__main__":
    key = jax.random.PRNGKey(0)

    def make_inputs(k, B, C, H, W):
        k1, k2 = jax.random.split(k)
        y_hat = jax.random.normal(k1, (B, C, H, W), dtype=jnp.float32)
        # labels from {-1 (background), 0 (neg), 0.5 (low-conf), 1 (pos)}
        cats = jax.random.randint(k2, (B, H, W), 0, 4)
        y = jnp.take(jnp.array([-1.0, 0.0, 0.5, 1.0], dtype=jnp.float32), cats)
        return y_hat, y

    cases = [
        (2, 4, 16, 16),   # padded path (spatial not grid-aligned)
        (1, 2, 32, 32),   # fast path: channel-0 BlockSpec select, NC=1
        (2, 3, 64, 64),   # fast path with megacore row-chunk axis (NC=2)
    ]
    keys = jax.random.split(key, len(cases))
    for k, (B, C, H, W) in zip(keys, cases):
        y_hat, y = make_inputs(k, B, C, H, W)
        loss = mask_loss(y_hat, y)
        jax.block_until_ready(loss)
        ref = mask_loss_ref(y_hat, y)
        assert jnp.allclose(loss, ref, rtol=1e-5, atol=1e-5), (B, C, H, W, loss, ref)

    # TODO(synk): reduce='none' elementwise output path is not exposed; only
    # the default reduce='mean' scalar loss is implemented.
    print("KERNEL_OK")
</pallas_src>

<mosaic_0001>
module attributes {stable_mosaic.version = 11 : i64} {
  func.func @mask_loss_kernel(%arg0: i32, %arg1: i32, %arg2: i32, %arg3: memref<1x1x8x128xf32, #tpu.memory_space<vmem>>, %arg4: memref<1x8x128xf32, #tpu.memory_space<vmem>>, %arg5: memref<1x1x8x128xf32, #tpu.memory_space<vmem>>, %arg6: memref<1x1x8x128xf32, #tpu.memory_space<vmem>>) attributes {dimension_semantics = [#tpu.dimension_semantics<parallel>, #tpu.dimension_semantics<parallel>, #tpu.dimension_semantics<arbitrary>], iteration_bounds = array<i64: 2, 1, 1>, scalar_prefetch = 0 : i64, scratch_operands = 0 : i64, tpu.core_type = #tpu.core_type<tc>, window_params = [{transform_indices = @transform_0, window_bounds = array<i64: 1, 1, 8, 128>}, {transform_indices = @transform_1, window_bounds = array<i64: 1, 8, 128>}, {transform_indices = @transform_2, window_bounds = array<i64: 1, 1, 8, 128>}, {transform_indices = @transform_3, window_bounds = array<i64: 1, 1, 8, 128>}]} {
    %c0_i32 = arith.constant 0 : i32
    %0 = arith.cmpi eq, %arg2, %c0_i32 : i32
    %1 = arith.extui %0 : i1 to i32
    %c0_i32_0 = arith.constant 0 : i32
    %2 = arith.cmpi ne, %1, %c0_i32_0 : i32
    scf.if %2 {
      %cst_35 = arith.constant 0.000000e+00 : f32
      %50 = vector.broadcast %cst_35 : f32 to vector<1x1x8x128xf32>
      %c0_36 = arith.constant 0 : index
      %c0_37 = arith.constant 0 : index
      %c0_38 = arith.constant 0 : index
      %c0_39 = arith.constant 0 : index
      %51 = vector.load %arg5[%c0_36, %c0_37, %c0_38, %c0_39] : memref<1x1x8x128xf32, #tpu.memory_space<vmem>>, vector<1x1x8x128xf32>
      tpu.vector_store %arg5[%c0_36, %c0_37, %c0_38, %c0_39], %50 {strides = array<i32>} : memref<1x1x8x128xf32, #tpu.memory_space<vmem>>, vector<1x1x8x128xf32>,
      %cst_40 = arith.constant 0.000000e+00 : f32
      %52 = vector.broadcast %cst_40 : f32 to vector<1x1x8x128xf32>
      %c0_41 = arith.constant 0 : index
      %c0_42 = arith.constant 0 : index
      %c0_43 = arith.constant 0 : index
      %c0_44 = arith.constant 0 : index
      %53 = vector.load %arg6[%c0_41, %c0_42, %c0_43, %c0_44] : memref<1x1x8x128xf32, #tpu.memory_space<vmem>>, vector<1x1x8x128xf32>
      tpu.vector_store %arg6[%c0_41, %c0_42, %c0_43, %c0_44], %52 {strides = array<i32>} : memref<1x1x8x128xf32, #tpu.memory_space<vmem>>, vector<1x1x8x128xf32>,
    } else {
    }
    %c0 = arith.constant 0 : index
    %c0_1 = arith.constant 0 : index
    %c0_2 = arith.constant 0 : index
    %c0_3 = arith.constant 0 : index
    %3 = vector.load %arg3[%c0, %c0_1, %c0_2, %c0_3] : memref<1x1x8x128xf32, #tpu.memory_space<vmem>>, vector<1x1x8x128xf32>
    %4 = vector.shape_cast %3 : vector<1x1x8x128xf32> to vector<8x128xf32>
    %c0_4 = arith.constant 0 : index
    %c0_5 = arith.constant 0 : index
    %c0_6 = arith.constant 0 : index
    %5 = vector.load %arg4[%c0_4, %c0_5, %c0_6] : memref<1x8x128xf32, #tpu.memory_space<vmem>>, vector<1x8x128xf32>
    %6 = vector.shape_cast %5 : vector<1x8x128xf32> to vector<8x128xf32>
    %cst = arith.constant 1.000000e+00 : f32
    %7 = vector.broadcast %cst : f32 to vector<8x128xf32>
    %8 = arith.cmpf oeq, %6, %7 : vector<8x128xf32>
    %cst_7 = arith.constant 0.000000e+00 : f32
    %9 = vector.broadcast %cst_7 : f32 to vector<8x128xf32>
    %10 = arith.cmpf oeq, %6, %9 : vector<8x128xf32>
    %11 = arith.ori %8, %10 : vector<8x128xi1>
    %cst_8 = arith.constant 0.000000e+00 : f32
    %12 = vector.broadcast %cst_8 : f32 to vector<8x128xf32>
    %13 = arith.subf %12, %4 : vector<8x128xf32>
    %14 = arith.select %8, %4, %13 : vector<8x128xi1>, vector<8x128xf32>
    %cst_9 = arith.constant 0.000000e+00 : f32
    %15 = vector.broadcast %cst_9 : f32 to vector<8x128xf32>
    %16 = arith.minimumf %14, %15 : vector<8x128xf32>
    %17 = math.absf %4 : vector<8x128xf32>
    %cst_10 = arith.constant 0.000000e+00 : f32
    %18 = vector.broadcast %cst_10 : f32 to vector<8x128xf32>
    %19 = arith.subf %18, %17 : vector<8x128xf32>
    %20 = math.exp %19 : vector<8x128xf32>
    %cst_11 = arith.constant 1.000000e+00 : f32
    %21 = vector.broadcast %cst_11 : f32 to vector<8x128xf32>
    %22 = arith.addf %21, %20 : vector<8x128xf32>
    %23 = math.log %22 : vector<8x128xf32>
    %24 = arith.subf %16, %23 : vector<8x128xf32>
    %cst_12 = arith.constant -9.21034049 : f32
    %cst_13 = arith.constant -1.000050e-04 : f32
    %25 = vector.broadcast %cst_12 : f32 to vector<8x128xf32>
    %26 = arith.maximumf %25, %24 : vector<8x128xf32>
    %27 = vector.broadcast %cst_13 : f32 to vector<8x128xf32>
    %28 = arith.minimumf %27, %26 : vector<8x128xf32>
    %cst_14 = arith.constant 0.000000e+00 : f32
    %29 = vector.broadcast %cst_14 : f32 to vector<8x128xf32>
    %30 = arith.select %11, %28, %29 : vector<8x128xi1>, vector<8x128xf32>
    %cst_15 = arith.constant 1.000000e+00 : f32
    %cst_16 = arith.constant 0.000000e+00 : f32
    %31 = vector.broadcast %cst_15 : f32 to vector<8x128xf32>
    %32 = vector.broadcast %cst_16 : f32 to vector<8x128xf32>
    %33 = arith.select %11, %31, %32 : vector<8x128xi1>, vector<8x128xf32>
    %c0_17 = arith.constant 0 : index
    %c0_18 = arith.constant 0 : index
    %c0_19 = arith.constant 0 : index
    %c0_20 = arith.constant 0 : index
    %34 = vector.load %arg5[%c0_17, %c0_18, %c0_19, %c0_20] : memref<1x1x8x128xf32, #tpu.memory_space<vmem>>, vector<1x1x8x128xf32>
    %35 = vector.shape_cast %34 : vector<1x1x8x128xf32> to vector<8x128xf32>
    %36 = vector.shape_cast %30 : vector<8x128xf32> to vector<1x8x128xf32>
    %cst_21 = arith.constant dense<0.000000e+00> : vector<8x128xf32>
    %37 = vector.multi_reduction <add>, %36, %cst_21 [0] : vector<1x8x128xf32> to vector<8x128xf32>
    %38 = arith.addf %35, %37 : vector<8x128xf32>
    %c0_22 = arith.constant 0 : index
    %c0_23 = arith.constant 0 : index
    %c0_24 = arith.constant 0 : index
    %c0_25 = arith.constant 0 : index
    %39 = vector.load %arg5[%c0_22, %c0_23, %c0_24, %c0_25] : memref<1x1x8x128xf32, #tpu.memory_space<vmem>>, vector<1x1x8x128xf32>
    %40 = vector.shape_cast %39 : vector<1x1x8x128xf32> to vector<8x128xf32>
    %41 = vector.shape_cast %38 : vector<8x128xf32> to vector<1x1x8x128xf32>
    tpu.vector_store %arg5[%c0_22, %c0_23, %c0_24, %c0_25], %41 {strides = array<i32>} : memref<1x1x8x128xf32, #tpu.memory_space<vmem>>, vector<1x1x8x128xf32>,
    %c0_26 = arith.constant 0 : index
    %c0_27 = arith.constant 0 : index
    %c0_28 = arith.constant 0 : index
    %c0_29 = arith.constant 0 : index
    %42 = vector.load %arg6[%c0_26, %c0_27, %c0_28, %c0_29] : memref<1x1x8x128xf32, #tpu.memory_space<vmem>>, vector<1x1x8x128xf32>
    %43 = vector.shape_cast %42 : vector<1x1x8x128xf32> to vector<8x128xf32>
    %44 = vector.shape_cast %33 : vector<8x128xf32> to vector<1x8x128xf32>
    %cst_30 = arith.constant dense<0.000000e+00> : vector<8x128xf32>
    %45 = vector.multi_reduction <add>, %44, %cst_30 [0] : vector<1x8x128xf32> to vector<8x128xf32>
    %46 = arith.addf %43, %45 : vector<8x128xf32>
    %c0_31 = arith.constant 0 : index
    %c0_32 = arith.constant 0 : index
    %c0_33 = arith.constant 0 : index
    %c0_34 = arith.constant 0 : index
    %47 = vector.load %arg6[%c0_31, %c0_32, %c0_33, %c0_34] : memref<1x1x8x128xf32, #tpu.memory_space<vmem>>, vector<1x1x8x128xf32>
    %48 = vector.shape_cast %47 : vector<1x1x8x128xf32> to vector<8x128xf32>
    %49 = vector.shape_cast %46 : vector<8x128xf32> to vector<1x1x8x128xf32>
    tpu.vector_store %arg6[%c0_31, %c0_32, %c0_33, %c0_34], %49 {strides = array<i32>} : memref<1x1x8x128xf32, #tpu.memory_space<vmem>>, vector<1x1x8x128xf32>,
    return
  }
  func.func @transform_0(%arg0: i32, %arg1: i32, %arg2: i32) -> (i32, i32, i32, i32) {
    %c1_i32 = arith.constant 1 : i32
    %0 = arith.muli %arg1, %c1_i32 : i32
    %1 = arith.addi %0, %arg2 : i32
    %c0_i32 = arith.constant 0 : i32
    %c0_i32_0 = arith.constant 0 : i32
    %c0_i32_1 = arith.constant 0 : i32
    return %arg0, %c0_i32, %1, %c0_i32_0 : i32, i32, i32, i32
  }
  func.func @transform_1(%arg0: i32, %arg1: i32, %arg2: i32) -> (i32, i32, i32) {
    %c1_i32 = arith.constant 1 : i32
    %0 = arith.muli %arg1, %c1_i32 : i32
    %1 = arith.addi %0, %arg2 : i32
    %c0_i32 = arith.constant 0 : i32
    %c0_i32_0 = arith.constant 0 : i32
    return %arg0, %1, %c0_i32 : i32, i32, i32
  }
  func.func @transform_2(%arg0: i32, %arg1: i32, %arg2: i32) -> (i32, i32, i32, i32) {
    %c0_i32 = arith.constant 0 : i32
    %c0_i32_0 = arith.constant 0 : i32
    %c0_i32_1 = arith.constant 0 : i32
    return %arg0, %arg1, %c0_i32, %c0_i32_0 : i32, i32, i32, i32
  }
  func.func @transform_3(%arg0: i32, %arg1: i32, %arg2: i32) -> (i32, i32, i32, i32) {
    %c0_i32 = arith.constant 0 : i32
    %c0_i32_0 = arith.constant 0 : i32
    %c0_i32_1 = arith.constant 0 : i32
    return %arg0, %arg1, %c0_i32, %c0_i32_0 : i32, i32, i32, i32
  }
}

</mosaic_0001>

<bundles_post_ra>
// kernel: tpu_custom_call.1
= control target key start
LH: loop header
LB: loop body
LE: loop exit
PB: predicated region body
PF: predicated region fallthrough
CT: control target
= control target key end

     0   :  { %9 = vsyncpa [#allocation3], 0  ;;  %s983_s0 = inlined_call_operand.hbm [shape: f32[2,1,8,128], index: 0, kind: input, shape index: {}]   ;;  %s984_s1 = inlined_call_operand.hbm [shape: f32[2,8,128], index: 1, kind: input, shape index: {}]   ;;  %s985_s2 = inlined_call_operand.hbm [shape: f32[2,1,8,128], index: 2, kind: output, shape index: {0}]   ;;  %s986_s3 = inlined_call_operand.hbm [shape: f32[2,1,8,128], index: 3, kind: output, shape index: {1}]  }
   0x1   :  { %11 = vsyncpa [#allocation3 + $0x1], 0 }
   0x2   :  { %12 = vsyncpa [#allocation6], 0 }
   0x3   :  { %14 = vsyncpa [#allocation6 + $0x1], 0 }
   0x4   :  { %15 = vsyncpa [#allocation4], 0 }
   0x5   :  { %17 = vsyncpa [#allocation4 + $0x1], 0 }
   0x6   :  { %18 = vsyncpa [#allocation9], 0 }
   0x7   :  { %20 = vsyncpa [#allocation9 + $0x1], 0  ;;  %s774_s12 = smov 0   ;;  %s776_s13 = smov 0  }
   0x8   :  { %s778_s14 = smov 0   ;;  %s780_s15 = smov 0  }
   0x9   :  { %s782_s16 = smov 0   ;;  %s784_s17 = smov 0  }
   0xa LB: > { %s481_s18 = sadd.s32 4294967295, %s747_s17   ;;  %s482_s19 = sadd.s32 4294967294, %s747_s17   ;;  %s747_s17 = sphi %s784_s17, %s26_s17   ;;  %s743_s16 = sphi %s782_s16, %s1000_s16   ;;  %s739_s15 = sphi %s780_s15, %s999_s15   ;;  %s735_s14 = sphi %s778_s14, %s998_s14   ;;  %s731_s13 = sphi %s776_s13, %s997_s13   ;;  %s727_s12 = sphi %s774_s12, %s996_s12  }
   0xb   : > { %s45_s20 = sadd.s32 1, %s743_s16  ;;  %s56_s21 = sadd.s32 1, %s735_s14 }
   0xc   : > { %p47_p0 = scmp.ge.s32.totalorder %s45_s20, 2  ;;  %p63_p1 = scmp.ne.s32.totalorder %s735_s14, %s731_s13 }
   0xd   : > { %p64_p2 = scmp.eq.s32.totalorder %s747_s17, 0  ;;  %p69_p3 = scmp.ne.s32.totalorder %s731_s13, %s727_s12 }
   0xe   : > { %s1002_s20 = smov (%p47_p0, %s45_s20), 0  ;;  %p70_p5 = scmp.eq.s32.totalorder %s481_s18, 0 }
   0xf   : > { %p815_p4 = por %p64_p2, %p63_p1  ;;  %s51_s23 = ssub.s32 %s743_s16, %s1002_s20 }
  0x10   : > { %p125_p6 = scmp.eq.s32.totalorder %s481_s18, 1  ;;  %p54_p7 = scmp.eq.s32.totalorder %s51_s23, 0 }
  0x11   : > { %p821_p8 = por %p70_p5, %p69_p3  ;;  %p131_p10 = scmp.eq.s32.totalorder %s482_s19, 1 }
  0x12   : > { %p825_p9 = por %p125_p6, %p63_p1  ;;  %p522_p13 = scmp.lt.s32.totalorder %s747_s17, 2 }
  0x13   : > { %s830_s26 = scalar_select %p54_p7, %s735_s14, %s56_s21  }
  0x14   : > { %p832_p11 = por %p131_p10, %p69_p3  ;;  %s839_s28 = sand.u32 1, %s735_s14  }
  0x15   : > { %s485_s29 = sshll.u32 %s839_s28, 3  ;;  %s486_s30 = sshll.u32 %s743_s16, 7 }
  0x16   : > { %s190_s6 = scalar_lea.hbm %s983_s0, %s486_s30  ;;  %s183_s7 = scalar_lea.vmem [#allocation2], %s485_s29 }
  0x17   : > { %s192_s8 = sshll.u32 %s183_s7, 4  ;;  %p848_p0 = pnand %p522_p13, %p815_p4  ;;  %s193_s8 = int_to_ptr.vmem [resolvable:$true] %s192_s8 }
  0x18   : > { %p489_p1 = scmp.ge.s32.totalorder %s747_s17, 1  ;;  %p217_p2 = scmp.lt.s32.totalorder %s747_s17, 3 }
  0x19   : > { %s180_s10 = scalar_lea.sflag [#allocation3], %s839_s28  ;;  %p579_p3 = pneg %p848_p0 }
  0x1a   : > { %s590_s11 = scalar_lea.vmem %s193_s8, 128  ;;  %s749_s18 = smov [#allocation2]  }
  0x1b   : > { %p591_p5 = scmp.ne.s32.totalorder %s193_s8, %s590_s11  ;;  %s595_s19 = sshll.u32 %s749_s18, 4  ;;  %s596_s19 = int_to_ptr.vmem [resolvable:$false] %s595_s19 }
  0x1c   : > { %s597_s21 = scalar_lea.vmem %s596_s19, 256  ;;  %p598_p4 = scmp.lt.s32.totalorder %s193_s8, %s596_s19 }
  0x1d   : > { %p593_p6 = pnand %p591_p5, %p579_p3  ;;  %p599_p10 = scmp.lt.s32.totalorder %s597_s21, %s590_s11 }
  0x1f   : > { %p594_p7 = pneg %p593_p6  ;;  %p600_p13 = por %p599_p10, %p598_p4 }
  0x21   : > { %p601_p12 = pnand %p600_p13, %p594_p7 }
  0x23   : > { %604 = shalt.err (!%p601_p12)
}
  0x24   : > { %511 = dma.hbm_to_vmem [thread:$0]  (!%p848_p0), %s190_s6, 128, %s193_s8, %s180_s10  }
  0x25   : > { %p866_p5 = pnand %p489_p1, %p217_p2  ;;  %s210_s5 = scalar_lea.hbm %s984_s1, %s486_s30 }
  0x26   : > { %s203_s7 = scalar_lea.vmem [#allocation5], %s485_s29  ;;  %s200_s18 = scalar_lea.sflag [#allocation6], %s839_s28 }
  0x27   : > { %s212_s11 = sshll.u32 %s203_s7, 4  ;;  %s750_s6 = smov [#allocation5]   ;;  %s213_s11 = int_to_ptr.vmem [resolvable:$true] %s212_s11 }
  0x28   : > { %s618_s19 = scalar_lea.vmem %s213_s11, 128  ;;  %s623_s8 = sshll.u32 %s750_s6, 4  ;;  %s624_s8 = int_to_ptr.vmem [resolvable:$false] %s623_s8 }
  0x29   : > { %p619_p12 = scmp.ne.s32.totalorder %s213_s11, %s618_s19  ;;  %s625_s10 = scalar_lea.vmem %s624_s8, 256 }
  0x2a   : > { %p626_p1 = scmp.lt.s32.totalorder %s213_s11, %s624_s8  ;;  %p627_p2 = scmp.lt.s32.totalorder %s625_s10, %s618_s19 }
  0x2b   : > { %p621_p6 = pnand %p619_p12, %p579_p3 }
  0x2c   : > { %p628_p4 = por %p627_p2, %p626_p1 }
  0x2d   : > { %p622_p7 = pneg %p621_p6 }
  0x2f   : > { %p629_p10 = pnand %p628_p4, %p622_p7 }
  0x31   : > { %632 = shalt.err (!%p629_p10)
}
  0x32   : > { %514 = dma.hbm_to_vmem [thread:$0]  (!%p848_p0), %s210_s5, 128, %s213_s11, %s200_s18  }
  0x33   : > { %221 = sbr.rel (%p866_p5) target bundleno = 121 (0x79), region = 28  ;;  %s882_s28 = sand.u32 (!%p866_p5), 1, %s731_s13  }
  0x34   : > { %s885_s29 = sshll.u32 (!%p866_p5), %s882_s28, 3  ;;  %s224_s30 = scalar_lea.sflag (!%p866_p5), [#allocation3], %s882_s28 }
  0x35   : > { %s227_s21 = scalar_lea.vmem (!%p866_p5), [#allocation2], %s885_s29 }
  0x38   : > { %710 = dma.done.wait (%p821_p8), %s224_s30, 128  }
  0x39   : > { %712 = vsyncadd (%p821_p8), %s224_s30, 4294967168  ;;  %s233_s9 = scalar_lea.sflag [#allocation6], %s882_s28  ;;  %s236_s22 = scalar_lea.vmem [#allocation5], %s885_s29 }
  0x3a   : > { %714 = dma.done.wait (%p821_p8), %s233_s9, 128  }
  0x3b   : > { %716 = vsyncadd (%p821_p8), %s233_s9, 4294967168  ;;  %v277_v0 = vld [vmem:[%s227_s21] sm:$0xff]  ;;  %v278_v1 = vld [vmem:[%s236_s22] sm:$0xff]  ;;  %s496_s23 = sshll.u32 %s739_s15, 7  ;;  %s268_s4 = scalar_lea.vmem [#allocation8], %s885_s29  ;;  %v751_v5 = vmov 0.0  }
  0x3c   : > { %vm279_vm0 = vcmp.eq.f32.partialorder %v278_v1, 1.0  ;;  %vm280_vm1 = vcmp.eq.f32.partialorder %v278_v1, 0.0  ;;  %v285_v2 = vand.u32 2147483647, %v277_v0  ;;  %s339_s5 = sshll.u32 %s268_s4, 4  ;;  %s913_s11 = scalar_lea.hbm %s986_s3, %s496_s23  ;;  %s915_s5 = int_to_ptr.vmem [resolvable:$true] %s339_s5 }
  0x3d   : > { %vm902_vm2 = vmor %vm279_vm0, %vm280_vm1  ;;  %s311_s18 = scalar_lea.sflag [#allocation9], %s882_s28  ;;  %s633_s19 = scalar_lea.vmem %s915_s5, 128 }
  0x3e   : > { %v286_v4 = vsub.f32 0.0, %v285_v2  ;;  %v296_v6 = vsel %vm902_vm2, 1.0, %v751_v5  ;;  %p634_p8 = scmp.ne.s32.totalorder %s915_s5, %s633_s19  ;;  %s752_s6 = smov [#allocation8]  }
  0x3f   : > { %304 = vst [vmem:[%s268_s4] sm:$0xff] %v296_v6  ;;  %s637_s8 = sshll.u32 %s752_s6, 4  ;;  %s638_s8 = int_to_ptr.vmem [resolvable:$false] %s637_s8 }
  0x40   : > { %v287_v7 = vmul.f32 1.442695, %v286_v4  ;;  %p635_p0 = pnand %p634_p8, %p825_p9  ;;  %s639_s10 = scalar_lea.vmem %s638_s8, 256 }
  0x41   : > { %p640_p13 = scmp.lt.s32.totalorder %s915_s5, %s638_s8  ;;  %p641_p5 = scmp.lt.s32.totalorder %s639_s10, %s633_s19 }
  0x42   : > { %573 = vpow2.f32 %v287_v7  ;;  %p636_p3 = pneg %p635_p0 }
  0x43   : > { %p642_p12 = por %p641_p5, %p640_p13 }
  0x45   : > { %p643_p6 = pnand %p642_p12, %p636_p3 }
  0x47   : > { %646 = shalt.err (!%p643_p6)
}
  0x48   : > { %s647_s30 = scalar_lea.hbm %s913_s11, 128  ;;  %s651_s22 = scalar_lea.hbm %s986_s3, 256 }
  0x49   : > { %p648_p7 = scmp.ne.s32.totalorder %s913_s11, %s647_s30  ;;  %p652_p4 = scmp.lt.s32.totalorder %s913_s11, %s986_s3 }
  0x4a   : > { %p653_p10 = scmp.lt.s32.totalorder %s651_s22, %s647_s30 }
  0x4b   : > { %p649_p1 = pnand %p648_p7, %p825_p9 }
  0x4c   : > { %p654_p8 = por %p653_p10, %p652_p4 }
  0x4d   : > { %p650_p2 = pneg %p649_p1 }
  0x4f   : > { %p655_p0 = pnand %p654_p8, %p650_p2 }
  0x51   : > { %658 = shalt.err (!%p655_p0)
}
  0x52   : > { %505 = dma.vmem_to_hbm [thread:$0]  (%p825_p9), %s915_s5, 128, %s913_s11, %s311_s18   ;;  %v574_v8 = vpop.eup %573  ;;  %v282_v10 = vsub.f32 0.0, %v277_v0 }
  0x53   : > { %v289_v9 = vadd.f32 1.0, %v574_v8  ;;  %s261_s7 = scalar_lea.vmem [#allocation7], %s885_s29  ;;  %s323_s18 = scalar_lea.hbm %s985_s2, %s496_s23 }
  0x54   : > { %v283_v11 = vsel %vm279_vm0, %v277_v0, %v282_v10  ;;  %s325_s19 = sshll.u32 %s261_s7, 4  ;;  %s306_s6 = scalar_lea.sflag [#allocation4], %s882_s28  ;;  %s326_s19 = int_to_ptr.vmem [resolvable:$true] %s325_s19 }
  0x55   : > { %575 = vlog2.f32 %v289_v9  ;;  %v284_v12 = vmin.f32 %v283_v11, 0.0  ;;  %s659_s8 = scalar_lea.vmem %s326_s19, 128  ;;  %s753_s10 = smov [#allocation7]  }
  0x56   : > { %p660_p3 = scmp.ne.s32.totalorder %s326_s19, %s659_s8  ;;  %s663_s30 = sshll.u32 %s753_s10, 4  ;;  %s664_s30 = int_to_ptr.vmem [resolvable:$false] %s663_s30 }
  0x57   : > { %s665_s29 = scalar_lea.vmem %s664_s30, 256  ;;  %p666_p12 = scmp.lt.s32.totalorder %s326_s19, %s664_s30 }
  0x58   : > { %p661_p13 = pnand %p660_p3, %p825_p9  ;;  %p667_p6 = scmp.lt.s32.totalorder %s665_s29, %s659_s8 }
  0x5a   : > { %p662_p5 = pneg %p661_p13  ;;  %p668_p7 = por %p667_p6, %p666_p12 }
  0x5c   : > { %p669_p1 = pnand %p668_p7, %p662_p5 }
  0x62   : > { %v576_v13 = vpop.eup %575 }
  0x63   : > { %v291_v14 = vmul.f32 0.6931472, %v576_v13 }
  0x65   : > { %v292_v15 = vsub.f32 %v284_v12, %v291_v14 }
  0x67   : > { %v293_v16 = vmax.f32 %v292_v15, -9.2103405 }
  0x69   : > { %v294_v17 = vmin.f32 %v293_v16, -0.000100005 }
  0x6b   : > { %v295_v18 = vsel %vm902_vm2, %v294_v17, 0.0 }
  0x6c   : > { %300 = vst [vmem:[%s261_s7] sm:$0xff] %v295_v18 }
  0x6d   : > { %672 = shalt.err (!%p669_p1)
}
  0x6e   : > { %s673_s15 = scalar_lea.hbm %s323_s18, 128  ;;  %s677_s21 = scalar_lea.hbm %s985_s2, 256 }
  0x6f   : > { %p674_p2 = scmp.ne.s32.totalorder %s323_s18, %s673_s15  ;;  %p678_p8 = scmp.lt.s32.totalorder %s323_s18, %s985_s2 }
  0x70   : > { %p679_p0 = scmp.lt.s32.totalorder %s677_s21, %s673_s15 }
  0x71   : > { %p675_p4 = pnand %p674_p2, %p825_p9 }
  0x72   : > { %p680_p3 = por %p679_p0, %p678_p8 }
  0x73   : > { %p676_p10 = pneg %p675_p4 }
  0x75   : > { %p681_p13 = pnand %p680_p3, %p676_p10 }
  0x77   : > { %684 = shalt.err (!%p681_p13)
}
  0x78   : > { %504 = dma.vmem_to_hbm [thread:$0]  (%p825_p9), %s326_s19, 128, %s323_s18, %s306_s6  }
  0x79 PF: > { %s351_s4 = sand.u32 1, %s727_s12   ;;  %p995_p5 = scmp.ge.s32.totalorder %s747_s17, 2 }
  0x7a   : > { %s352_s24 = scalar_lea.sflag [#allocation4], %s351_s4 }
  0x7b   : > { %p516_p12 = pnand %p995_p5, %p832_p11 }
  0x7d   : > { %p517_p6 = pneg %p516_p12 }
  0x7f   : > { %718 = dma.done.wait (%p517_p6), %s352_s24, 128  }
  0x80   : > { %720 = vsyncadd (%p517_p6), %s352_s24, 4294967168  ;;  %s361_s7 = scalar_lea.sflag [#allocation9], %s351_s4 }
  0x81   : > { %722 = dma.done.wait (%p517_p6), %s361_s7, 128  }
  0x82   : > { %724 = vsyncadd (%p517_p6), %s361_s7, 4294967168  ;;  %s26_s17 = sadd.s32 1, %s747_s17   ;;  %s996_s12 = smov %s731_s13 }
  0x83   : > { %p23_p7 = scmp.ge.s32.totalorder %s26_s17, 4   ;;  %s997_s13 = smov %s735_s14 }
  0x84   : > { %s998_s14 = smov %s830_s26  ;;  %s999_s15 = smov %s743_s16 }
  0x85   : > { %s1000_s16 = smov %s1002_s20  ;;  %25 = sbr.rel (!%p23_p7) target bundleno = 10 (0xa), region = 107 }
  0x8a   :  { %366 = vsyncpa [#allocation3], 1 }
  0x8b   :  { %368 = vsyncpa [#allocation3 + $0x1], 1 }
  0x8c   :  { %369 = vsyncpa [#allocation6], 1 }
  0x8d   :  { %371 = vsyncpa [#allocation6 + $0x1], 1 }
  0x8e   :  { %372 = vsyncpa [#allocation4], 1 }
  0x8f   :  { %374 = vsyncpa [#allocation4 + $0x1], 1 }
  0x90   :  { %375 = vsyncpa [#allocation9], 1 }
  0x91   :  { %377 = vsyncpa [#allocation9 + $0x1], 1 }

</bundles_post_ra>
